<compile_context>
chip_gen: v7x
topology: tpu7x:2x2x1
jax: 0.10.0
libtpu: 0.0.40
codegen_flags: <defaults>
</compile_context>

<pallas_src>
import math

import jax
import jax.numpy as jnp
from jax import lax
from jax.experimental import pallas as pl
from jax.experimental.pallas import tpu as pltpu


def _glu_kernel(out_ref, gate_ref, o_ref):
    # out_ref / gate_ref / o_ref: (tpre, tc, tp)
    out = out_ref[...].astype(jnp.float32)
    gate = gate_ref[...].astype(jnp.float32)
    o_ref[...] = (out * jax.nn.sigmoid(gate)).astype(o_ref.dtype)


def _glu_jnp(x, dim):
    """Fused-XLA fallback (also used as the correctness reference)."""
    half = x.shape[dim] // 2
    out = lax.slice_in_dim(x, 0, half, axis=dim)
    gate = lax.slice_in_dim(x, half, 2 * half, axis=dim)
    return (out.astype(jnp.float32)
            * jax.nn.sigmoid(gate.astype(jnp.float32))).astype(x.dtype)


def _sublane_quantum(itemsize):
    return {4: 8, 2: 16, 1: 32}.get(itemsize, 8)


def _target_block_bytes():
    """Per-step output-block byte budget, sized per TPU generation."""
    try:
        kind = jax.devices()[0].device_kind.lower()
    except Exception:
        kind = ""
    if "v5 lite" in kind or "v5e" in kind or "v5lite" in kind:
        return 2 << 20   # v5e: 16 MiB scoped-VMEM default -> ~12 MiB footprint
    return 4 << 20       # v6e / v7x: ~24 MiB double-buffered footprint


def _lane_dense_factor(n, max_lanes=4096):
    """Factor n == rows * lanes with a dense trailing (lane) dim.

    Prefers lanes that are a multiple of 128 (unmasked vector stores) while
    keeping rows >= 8 when possible (sublane utilization).  The factorization
    is applied to a contiguous slab, so the reshape realizing it is free.
    """
    if n <= max_lanes:
        return 1, n
    divs = [d for d in range(128, max_lanes + 1, 128) if n % d == 0]
    if divs:
        pref = [d for d in divs if n // d >= 8]
        lanes = max(pref) if pref else max(divs)
        return n // lanes, lanes
    # No multiple-of-128 divisor <= max_lanes: take the largest divisor.
    best = 1
    i = 1
    while i * i <= n:
        if n % i == 0:
            for d in (i, n // i):
                if d <= max_lanes and d > best:
                    best = d
        i += 1
    return n // best, best


def _pick_tiles(pre, rows, lanes, itemsize, target_bytes):
    """Choose (tpre, tc, tp) with tpre*tc*tp*itemsize ~<= target_bytes."""
    sub_q = _sublane_quantum(itemsize)
    target_elems = max(1, target_bytes // itemsize)

    # Lane tile: full extent if it fits the budget, else a multiple of 128.
    if lanes <= target_elems:
        tp = lanes
    else:
        tp = min(lanes, max(128, (target_elems // 128) * 128))
    budget = max(1, target_elems // tp)

    # Row (sublane) tile: full extent or a multiple of the sublane quantum.
    if rows <= budget:
        tc = rows
    else:
        tc = min(rows, max(sub_q, (budget // sub_q) * sub_q))
    budget = max(1, budget // tc)

    # Fold `pre` into the block to amortize per-grid-step overhead.
    tpre = max(1, min(pre, budget))
    return tpre, tc, tp


def glu_pallas(x, dim=1, *, min_pallas_bytes=1 << 20):
    """GLU over axis `dim` (axis size must be even)."""
    shape = x.shape
    dim = dim % len(shape)
    c = shape[dim]
    assert c % 2 == 0, "GLU split axis must have even size"
    half = c // 2
    out_shape = shape[:dim] + (half,) + shape[dim + 1:]

    # Small-input fast path: XLA fuses the elementwise op; a pallas_call
    # launch plus per-step overhead would dominate at KB scale.
    itemsize = x.dtype.itemsize
    if x.size * itemsize < min_pallas_bytes:
        return _glu_jnp(x, dim)

    pre = math.prod(shape[:dim])
    post = math.prod(shape[dim + 1:])
    n = half * post                       # contiguous elements per half

    # Lane-dense flattening of each half's contiguous slab (metadata-only).
    rows, lanes = _lane_dense_factor(n)
    x4 = x.reshape(pre, 2, rows, lanes)

    sub_q = _sublane_quantum(itemsize)
    tpre, tc, tp = _pick_tiles(pre, rows, lanes, itemsize, _target_block_bytes())

    # Make sure a >=1 MiB problem never collapses to one grid step, so both
    # v7x TensorCores get work (harmless on single-TC v5e/v6e).
    steps = pl.cdiv(pre, tpre) * pl.cdiv(rows, tc) * pl.cdiv(lanes, tp)
    if steps == 1 and pre * n * itemsize >= (1 << 20):
        if tpre >= 2:
            tpre = -(-tpre // 2)
        elif tc >= 2 * sub_q:
            tc = -(-(tc // 2) // sub_q) * sub_q
        elif tp >= 256:
            tp = -(-(tp // 2) // 128) * 128

    grid = (pl.cdiv(pre, tpre), pl.cdiv(rows, tc), pl.cdiv(lanes, tp))

    # Double-buffered footprint ~ 2 * (2 input blocks + 1 output block),
    # plus headroom for compiler temps (f32 intermediates for bf16 inputs).
    block_bytes = tpre * tc * tp * itemsize
    vmem_limit = int(max(16 << 20, 8 * block_bytes + (4 << 20)))

    def half_spec(h):
        # Squeezed (None) block dim selects the "out" (h=0) / "gate" (h=1) half.
        return pl.BlockSpec((tpre, None, tc, tp),
                            lambda i, r, l, _h=h: (i, _h, r, l))

    out3 = pl.pallas_call(
        _glu_kernel,
        out_shape=jax.ShapeDtypeStruct((pre, rows, lanes), x.dtype),
        grid=grid,
        in_specs=[half_spec(0), half_spec(1)],
        out_specs=pl.BlockSpec((tpre, tc, tp), lambda i, r, l: (i, r, l)),
        compiler_params=pltpu.CompilerParams(
            dimension_semantics=("parallel", "parallel", "parallel"),
            vmem_limit_bytes=vmem_limit,
        ),
    )(x4, x4)

    # Inverse of the free reshapes above (also metadata-only).
    return out3.reshape(out_shape)


if __name__ == "__main__":
    key = jax.random.PRNGKey(0)
    k1, k2, k3, k4 = jax.random.split(key, 4)

    # 1) Spec shape (NCHW, split on channels). Force the Pallas path even
    #    though it's tiny, to validate the kernel at the module's shape.
    x1 = jax.random.normal(k1, (2, 4, 16, 16), dtype=jnp.float32)
    y1 = glu_pallas(x1, dim=1, min_pallas_bytes=0)
    jax.block_until_ready(y1)
    assert y1.shape == (2, 2, 16, 16), y1.shape
    assert jnp.allclose(y1, _glu_jnp(x1, 1), atol=1e-5, rtol=1e-5)

    # 2) bf16 with spatial extent that is not a multiple of 128 -> exercises
    #    the lane-dense flattening and f32 internal compute.
    x2 = jax.random.normal(k2, (2, 16, 24, 24), dtype=jnp.bfloat16)
    y2 = glu_pallas(x2, dim=1, min_pallas_bytes=0)
    jax.block_until_ready(y2)
    assert y2.shape == (2, 8, 24, 24), y2.shape
    assert jnp.allclose(y2.astype(jnp.float32),
                        _glu_jnp(x2, 1).astype(jnp.float32),
                        atol=2e-2, rtol=2e-2)

    # 3) Big enough to take the Pallas path by default and to produce a
    #    multi-step all-"parallel" grid (pre folded into the block).
    x3 = jax.random.normal(k3, (2, 256, 32, 32), dtype=jnp.float32)
    y3 = glu_pallas(x3, dim=1)
    jax.block_until_ready(y3)
    assert y3.shape == (2, 128, 32, 32), y3.shape
    assert jnp.allclose(y3, _glu_jnp(x3, 1), atol=1e-5, rtol=1e-5)

    # 4) Split along the last axis (Pallas path) + default small-input
    #    jnp fallback path.
    x4 = jax.random.normal(k4, (2, 6, 8), dtype=jnp.float32)
    y4a = glu_pallas(x4, dim=-1, min_pallas_bytes=0)   # Pallas kernel
    y4b = glu_pallas(x4, dim=-1)                       # jnp fallback
    jax.block_until_ready((y4a, y4b))
    assert y4a.shape == (2, 6, 4), y4a.shape
    assert jnp.allclose(y4a, _glu_jnp(x4, 2), atol=1e-5, rtol=1e-5)
    assert jnp.allclose(y4b, _glu_jnp(x4, 2), atol=1e-5, rtol=1e-5)

    print("KERNEL_OK")
</pallas_src>

<mosaic_0001>
module attributes {stable_mosaic.version = 11 : i64} {
  func.func @_glu_kernel(%arg0: i32, %arg1: i32, %arg2: i32, %arg3: memref<2x1x1x512xf32, #tpu.memory_space<vmem>>, %arg4: memref<2x1x1x512xf32, #tpu.memory_space<vmem>>, %arg5: memref<2x1x512xf32, #tpu.memory_space<vmem>>) attributes {dimension_semantics = [#tpu.dimension_semantics<parallel>, #tpu.dimension_semantics<parallel>, #tpu.dimension_semantics<parallel>], iteration_bounds = array<i64: 1, 1, 1>, scalar_prefetch = 0 : i64, scratch_operands = 0 : i64, tpu.core_type = #tpu.core_type<tc>, window_params = [{transform_indices = @transform_0, window_bounds = array<i64: 2, 1, 1, 512>}, {transform_indices = @transform_1, window_bounds = array<i64: 2, 1, 1, 512>}, {transform_indices = @transform_2, window_bounds = array<i64: 2, 1, 512>}]} {
    %c0 = arith.constant 0 : index
    %c0_0 = arith.constant 0 : index
    %c0_1 = arith.constant 0 : index
    %c0_2 = arith.constant 0 : index
    %0 = vector.load %arg3[%c0, %c0_0, %c0_1, %c0_2] : memref<2x1x1x512xf32, #tpu.memory_space<vmem>>, vector<2x1x1x512xf32>
    %1 = vector.shape_cast %0 : vector<2x1x1x512xf32> to vector<2x1x512xf32>
    %c0_3 = arith.constant 0 : index
    %c0_4 = arith.constant 0 : index
    %c0_5 = arith.constant 0 : index
    %c0_6 = arith.constant 0 : index
    %2 = vector.load %arg4[%c0_3, %c0_4, %c0_5, %c0_6] : memref<2x1x1x512xf32, #tpu.memory_space<vmem>>, vector<2x1x1x512xf32>
    %3 = vector.shape_cast %2 : vector<2x1x1x512xf32> to vector<2x1x512xf32>
    %4 = arith.negf %3 : vector<2x1x512xf32>
    %5 = math.exp %4 : vector<2x1x512xf32>
    %cst = arith.constant 1.000000e+00 : f32
    %6 = vector.broadcast %cst : f32 to vector<2x1x512xf32>
    %7 = arith.addf %6, %5 : vector<2x1x512xf32>
    %8 = arith.divf %6, %7 : vector<2x1x512xf32>
    %9 = arith.mulf %1, %8 : vector<2x1x512xf32>
    %c0_7 = arith.constant 0 : index
    %c0_8 = arith.constant 0 : index
    %c0_9 = arith.constant 0 : index
    %10 = vector.load %arg5[%c0_7, %c0_8, %c0_9] : memref<2x1x512xf32, #tpu.memory_space<vmem>>, vector<2x1x512xf32>
    tpu.vector_store %arg5[%c0_7, %c0_8, %c0_9], %9 {strides = array<i32>} : memref<2x1x512xf32, #tpu.memory_space<vmem>>, vector<2x1x512xf32>,
    return
  }
  func.func @transform_0(%arg0: i32, %arg1: i32, %arg2: i32) -> (i32, i32, i32, i32) {
    %c0_i32 = arith.constant 0 : i32
    %c0_i32_0 = arith.constant 0 : i32
    return %arg0, %c0_i32, %arg1, %arg2 : i32, i32, i32, i32
  }
  func.func @transform_1(%arg0: i32, %arg1: i32, %arg2: i32) -> (i32, i32, i32, i32) {
    %c1_i32 = arith.constant 1 : i32
    %c0_i32 = arith.constant 0 : i32
    return %arg0, %c1_i32, %arg1, %arg2 : i32, i32, i32, i32
  }
  func.func @transform_2(%arg0: i32, %arg1: i32, %arg2: i32) -> (i32, i32, i32) {
    %c0_i32 = arith.constant 0 : i32
    return %arg0, %arg1, %arg2 : i32, i32, i32
  }
}

</mosaic_0001>

<bundles_post_ra>
// kernel: tpu_custom_call.1
= control target key start
LH: loop header
LB: loop body
LE: loop exit
PB: predicated region body
PF: predicated region fallthrough
CT: control target
= control target key end

     0   :  { %7 = vsyncpa [#allocation3], 0  ;;  %s241_s0 = inlined_call_operand.hbm [shape: f32[2,2,1,512], index: 0, kind: input, shape index: {}]   ;;  %s242_s1 = inlined_call_operand.hbm [shape: f32[2,2,1,512], index: 1, kind: input, shape index: {}]   ;;  %s243_s2 = inlined_call_operand.hbm [shape: f32[2,1,512], index: 2, kind: output, shape index: {}]  }
   0x1   :  { %8 = vsyncpa [#allocation6], 0 }
   0x2   :  { %9 = vsyncpa [#allocation4], 0  ;;  %s174_s9 = smov [#allocation2]   ;;  %s99_s13 = scalar_lea.hbm %s241_s0, 128 }
   0x3   :  { %s15_s10 = sshll.u32 %s174_s9, 4  ;;  %p100_p0 = scmp.ne.s32.totalorder %s241_s0, %s99_s13  ;;  %s16_s10 = int_to_ptr.vmem [resolvable:$true] %s15_s10 }
   0x4   :  { %s101_s18 = scalar_lea.hbm %s241_s0, 256  ;;  %p103_p2 = scmp.lt.u32.totalorder %s99_s13, %s241_s0 }
   0x5   :  { %p102_p1 = scmp.lt.u32.totalorder %s101_s18, %s99_s13 }
   0x7   :  { %p104_p3 = por %p103_p2, %p102_p1 }
   0x9   :  { %p105_p4 = pnand %p104_p3, %p100_p0 }
   0xb   :  { %108 = shalt.err (!%p105_p4)
}
   0xc   :  { %s109_s21 = scalar_lea.vmem %s16_s10, 128  ;;  %p114_p6 = scmp.lt.s32.totalorder %s16_s10, %s16_s10 }
   0xd   :  { %p110_p5 = scmp.ne.s32.totalorder %s16_s10, %s109_s21  ;;  %p115_p7 = scmp.lt.s32.totalorder %s109_s21, %s109_s21 }
   0xf   :  { %p116_p8 = por %p115_p7, %p114_p6 }
  0x11   :  { %p117_p9 = pnand %p116_p8, %p110_p5 }
  0x13   :  { %120 = shalt.err (!%p117_p9)
}
  0x14   :  { %s175_s22 = smov 128   ;;  %s176_s23 = smov 64  }
  0x15   :  { %s177_s24 = smov 4   ;;  %s27_s29 = scalar_lea.hbm %s242_s1, 64 }
  0x16   :  { %21 = dma.hbm_to_vmem [thread:$0]  %s241_s0, 128, %s16_s10, [#allocation3], %s175_s22, %s176_s23, %s177_s24  }
  0x17   :  { %s178_s30 = smov [#allocation5]   ;;  %s145_s6 = scalar_lea.hbm %s242_s1, 192 }
  0x18   :  { %s28_s3 = sshll.u32 %s178_s30, 4  ;;  %p122_p10 = scmp.ne.s32.totalorder %s27_s29, %s145_s6  ;;  %s29_s3 = int_to_ptr.vmem [resolvable:$true] %s28_s3 }
  0x19   :  { %s123_s9 = scalar_lea.hbm %s242_s1, 256  ;;  %p124_p11 = scmp.lt.u32.totalorder %s27_s29, %s242_s1 }
  0x1a   :  { %p125_p12 = scmp.lt.u32.totalorder %s123_s9, %s145_s6  ;;  %p127_p0 = scmp.lt.u32.totalorder %s145_s6, %s27_s29 }
  0x1c   :  { %p126_p13 = por %p125_p12, %p124_p11 }
  0x1e   :  { %p128_p1 = por %p127_p0, %p126_p13 }
  0x20   :  { %p129_p2 = pnand %p128_p1, %p122_p10 }
  0x22   :  { %132 = shalt.err (!%p129_p2)
}
  0x23   :  { %s133_s0 = scalar_lea.vmem %s29_s3, 128  ;;  %p138_p4 = scmp.lt.s32.totalorder %s29_s3, %s29_s3 }
  0x24   :  { %p134_p3 = scmp.ne.s32.totalorder %s29_s3, %s133_s0  ;;  %p139_p5 = scmp.lt.s32.totalorder %s133_s0, %s133_s0 }
  0x26   :  { %p140_p6 = por %p139_p5, %p138_p4 }
  0x28   :  { %p141_p7 = pnand %p140_p6, %p134_p3 }
  0x2a   :  { %144 = shalt.err (!%p141_p7)
}
  0x2b   :  { %34 = dma.hbm_to_vmem [thread:$0]  %s27_s29, 128, %s29_s3, [#allocation6], %s175_s22, %s176_s23, %s177_s24  }
  0x2c   :  { %168 = dma.done.wait [#allocation3], 128  }
  0x2d   :  { %169 = vsyncadd [#allocation3], 4294967168 }
  0x2e   :  { %170 = dma.done.wait [#allocation6], 128  }
  0x2f   :  { %171 = vsyncadd [#allocation6], 4294967168  ;;  %v43_v0 = vld [vmem:[#allocation5] sm:$0xf]  ;;  %v44_v2 = vld [vmem:[#allocation5 + $0x4] sm:$0xf]  ;;  %v59_v8 = vlaneseq }
  0x30   :  { %v83_v1 = vmul.f32 -1.442695, %v43_v0  ;;  %v84_v3 = vmul.f32 -1.442695, %v44_v2  ;;  %v41_v9 = vld [vmem:[#allocation2] sm:$0xf] }
  0x31   :  { %v42_v10 = vld [vmem:[#allocation2 + $0x4] sm:$0xf]  ;;  %s179_s1 = smov [#allocation7]   ;;  %vm61_vm0 = vcmp.lt.s32.totalorder %v59_v8, 512 }
  0x32   :  { %91 = vpow2.f32 %v83_v1  ;;  %s70_s10 = sshll.u32 %s179_s1, 4  ;;  %s71_s10 = int_to_ptr.vmem [resolvable:$true] %s70_s10 }
  0x33   :  { %93 = vpow2.f32 %v84_v3  ;;  %s146_s13 = scalar_lea.vmem %s71_s10, 128  ;;  %p151_p9 = scmp.lt.s32.totalorder %s71_s10, %s71_s10 }
  0x34   :  { %p147_p8 = scmp.ne.s32.totalorder %s71_s10, %s146_s13  ;;  %p152_p10 = scmp.lt.s32.totalorder %s146_s13, %s146_s13 }
  0x36   :  { %p153_p11 = por %p152_p10, %p151_p9 }
  0x38   :  { %p154_p12 = pnand %p153_p11, %p147_p8 }
  0x3c   :  { %v92_v4 = vpop.eup %91 }
  0x3d   :  { %v94_v5 = vpop.eup %93  ;;  %v51_v6 = vadd.f32 1.0, %v92_v4 }
  0x3e   :  { %v52_v7 = vadd.f32 1.0, %v94_v5 }
  0x3f   :  { %95 = vrcp.f32 %v51_v6 }
  0x40   :  { %97 = vrcp.f32 %v52_v7 }
  0x49   :  { %v96_v11 = vpop.eup %95 }
  0x4a   :  { %v98_v12 = vpop.eup %97  ;;  %v57_v13 = vmul.f32 %v96_v11, %v41_v9 }
  0x4b   :  { %v58_v14 = vmul.f32 %v98_v12, %v42_v10 }
  0x4c   :  { %63 = vst.msk [vmem:[#allocation7] sm:$0xf] %vm61_vm0, %v57_v13 }
  0x4d   :  { %64 = vst.msk [vmem:[#allocation7 + $0x4] sm:$0xf] %vm61_vm0, %v58_v14 }
  0x4e   :  { %157 = shalt.err (!%p154_p12)
}
  0x4f   :  { %s158_s16 = scalar_lea.hbm %s243_s2, 128 }
  0x50   :  { %p159_p13 = scmp.ne.s32.totalorder %s243_s2, %s158_s16  ;;  %p162_p0 = scmp.lt.u32.totalorder %s158_s16, %s243_s2 }
  0x52   :  { %p164_p1 = pnand %p162_p0, %p159_p13 }
  0x54   :  { %167 = shalt.err (!%p164_p1)
}
  0x55   :  { %76 = dma.vmem_to_hbm [thread:$0]  %s71_s10, 128, %s243_s2, [#allocation4], %s176_s23, %s176_s23, %s177_s24  }
  0x56   :  { %172 = dma.done.wait [#allocation4], 128  }
  0x57   :  { %173 = vsyncadd [#allocation4], 4294967168 }
  0x58   :  { %80 = vsyncpa [#allocation3], 1 }
  0x59   :  { %81 = vsyncpa [#allocation6], 1 }
  0x5a   :  { %82 = vsyncpa [#allocation4], 1 }

</bundles_post_ra>
